<compile_context>
chip_gen: v7x
topology: tpu7x:2x2x1
jax: 0.10.0
libtpu: 0.0.40
codegen_flags: <defaults>
</compile_context>

<pallas_src>
import functools

import jax
import jax.numpy as jnp
from jax.experimental import pallas as pl
from jax.experimental.pallas import tpu as pltpu

_SUB = 16     # sublane alignment safe for f32 (8) and bf16 (16)
_LANE = 128   # lane width


def _round_up(x, m):
    return (x + m - 1) // m * m


def _conv_tbc_kernel(x_cur_ref, x_nxt_ref, w_ref, b_ref, o_ref,
                     x_buf, acc_ref, *, B, K, C_in, tm, halo_pad, fold):
    """Compute one (tm x tn) output tile of ConvTBC.

    x_cur_ref: (tm, C_in)          rows [i*tm, (i+1)*tm) of the flattened input
    x_nxt_ref: (tm, C_in)          next tile; its head supplies the halo rows
    w_ref:     (K*C_in, tn)        weight with taps folded into the row dim
    b_ref:     (1, tn)             bias (f32)
    o_ref:     (tm, tn)            output tile
    x_buf:     (tm+halo_pad, C_in) VMEM scratch: tile + halo window
    acc_ref:   (tm, tn) f32        VMEM accumulator
    """
    # Assemble the halo'd input window with two sublane-aligned stores
    # (tm and halo_pad are multiples of the sublane tile).
    x_buf[:tm, :] = x_cur_ref[...]
    if halo_pad > 0:
        x_buf[tm:, :] = x_nxt_ref[:halo_pad, :]

    if fold:
        # Small C_in: fold the K taps into the contraction dimension so the
        # whole tile is a single MXU matmul (contraction = K*C_in); the
        # accumulation happens inside the MXU — no per-tap VALU adds or
        # extra result-FIFO drains.
        x_fold = jnp.concatenate(
            [x_buf[pl.ds(k * B, tm), :] for k in range(K)], axis=-1)
        acc_ref[...] = jnp.dot(x_fold, w_ref[...],
                               preferred_element_type=jnp.float32)
    else:
        # Large C_in: per-tap MXU matmuls, accumulated in the f32 VMEM scratch.
        for k in range(K):
            contrib = jnp.dot(x_buf[pl.ds(k * B, tm), :],
                              w_ref[pl.ds(k * C_in, C_in), :],
                              preferred_element_type=jnp.float32)
            if k == 0:
                acc_ref[...] = contrib
            else:
                acc_ref[...] += contrib

    o_ref[...] = (acc_ref[...] + b_ref[...].astype(jnp.float32)).astype(o_ref.dtype)


def conv_tbc(x, weight, bias, padding=0, *, compute_dtype=None,
             tm_max=512, tn_max=512):
    """Pallas TPU equivalent of torch.conv_tbc(x, weight, bias, padding).

    x: (T, B, C_in), weight: (K, C_in, C_out), bias: (C_out,)
    Returns (T + 2*padding - K + 1, B, C_out) in x.dtype.
    Set compute_dtype=jnp.bfloat16 to run the matmuls at MXU bf16 peak
    (f32 accumulation is kept either way).
    """
    T, B, C_in = x.shape
    K, w_cin, C_out = weight.shape
    assert w_cin == C_in
    T_out = T + 2 * padding - K + 1
    assert T_out > 0

    out_dtype = x.dtype
    if compute_dtype is not None:
        x = x.astype(compute_dtype)
        weight = weight.astype(compute_dtype)
    cdtype = x.dtype

    M = T_out * B                 # flattened output rows
    halo = (K - 1) * B            # extra input rows needed per M tile
    halo_pad = _round_up(halo, _SUB) if halo > 0 else 0

    # ---- tiling ----------------------------------------------------------
    tm = min(tm_max, _round_up(M, _SUB))
    tm = max(tm, halo_pad)        # halo must fit inside one "next" tile
    n_m = -(-M // tm)
    M_p = n_m * tm

    # Lane-dense output: pad C_out to a multiple of 128; N tile is a
    # 128-multiple (avoids masked partial stores, matches MXU columns).
    C_out_p = _round_up(C_out, _LANE)
    tn = C_out_p
    if tn > tn_max:
        for cand in (512, 384, 256, 128):
            if cand <= tn_max and C_out_p % cand == 0:
                tn = cand
                break
    n_n = C_out_p // tn

    # ---- operand prep (HBM side) ------------------------------------------
    # Pad T by `padding`, flatten (T_pad, B, C) -> rows, then pad the row count
    # so that (n_m + 1) full tiles exist: tile i+1 supplies tile i's halo rows,
    # so no overlapping BlockSpec windows are ever required.
    # TODO(synk): this jnp.pad costs one extra HBM pass over x; a manual-DMA
    # halo fetch (memory_space=pl.ANY + pltpu.make_async_copy) would remove it.
    rows_needed = (n_m + 1) * tm
    x_pad = jnp.pad(x, ((padding, padding), (0, 0), (0, 0)))
    x_flat = x_pad.reshape((T + 2 * padding) * B, C_in)
    x_flat = jnp.pad(x_flat, ((0, rows_needed - x_flat.shape[0]), (0, 0)))

    w_flat = jnp.pad(weight, ((0, 0), (0, 0), (0, C_out_p - C_out)))
    w_flat = w_flat.reshape(K * C_in, C_out_p)              # taps -> rows
    b_row = jnp.pad(bias.astype(jnp.float32), ((0, C_out_p - C_out),))
    b_row = b_row.reshape(1, C_out_p)

    fold = C_in < 128   # fold taps into one matmul when the contraction is tiny

    kernel = functools.partial(_conv_tbc_kernel, B=B, K=K, C_in=C_in,
                               tm=tm, halo_pad=halo_pad, fold=fold)
    grid_spec = pltpu.PrefetchScalarGridSpec(
        num_scalar_prefetch=0,
        grid=(n_m, n_n),
        in_specs=[
            # current input tile (streamed + double-buffered by Pallas)
            pl.BlockSpec((tm, C_in), lambda i, j: (i, 0)),
            # next input tile (halo source); constant across the inner j axis
            pl.BlockSpec((tm, C_in), lambda i, j: (i + 1, 0)),
            # weight: constant along i -> stays VMEM-resident across M tiles
            pl.BlockSpec((K * C_in, tn), lambda i, j: (0, j)),
            # bias
            pl.BlockSpec((1, tn), lambda i, j: (0, j)),
        ],
        out_specs=pl.BlockSpec((tm, tn), lambda i, j: (i, j)),
        scratch_shapes=[
            pltpu.VMEM((tm + halo_pad, C_in), cdtype),   # halo'd input window
            pltpu.VMEM((tm, tn), jnp.float32),           # f32 accumulator
        ],
    )
    out_flat = pl.pallas_call(
        kernel,
        out_shape=jax.ShapeDtypeStruct((M_p, C_out_p), out_dtype),
        grid_spec=grid_spec,
        compiler_params=pltpu.CompilerParams(
            # Every grid point is independent -> megacore-shardable on v7x.
            dimension_semantics=("parallel", "parallel"),
            # Explicit scoped-VMEM budget, below v7x's 64 MiB physical VMEM.
            vmem_limit_bytes=48 * 1024 * 1024,
        ),
    )(x_flat, x_flat, w_flat, b_row)

    return out_flat[:M, :C_out].reshape(T_out, B, C_out)


def _conv_tbc_reference(x, weight, bias, padding=0):
    """Pure-JAX reference implementing torch.conv_tbc semantics (f32, exact)."""
    T, B, C_in = x.shape
    K, _, C_out = weight.shape
    T_out = T + 2 * padding - K + 1
    x_pad = jnp.pad(x.astype(jnp.float32), ((padding, padding), (0, 0), (0, 0)))
    out = jnp.broadcast_to(bias.astype(jnp.float32), (T_out, B, C_out))
    for k in range(K):
        out = out + jnp.einsum(
            "tbc,co->tbo", x_pad[k:k + T_out], weight[k].astype(jnp.float32),
            precision=jax.lax.Precision.HIGHEST)
    return out.astype(x.dtype)


if __name__ == "__main__":
    def _check(x, w, b, padding, atol, rtol, **kw):
        out = jax.block_until_ready(conv_tbc(x, w, b, padding=padding, **kw))
        ref = _conv_tbc_reference(x, w, b, padding=padding)
        assert out.shape == ref.shape, (out.shape, ref.shape)
        err = float(jnp.max(jnp.abs(out.astype(jnp.float32)
                                    - ref.astype(jnp.float32))))
        assert jnp.allclose(out, ref, atol=atol, rtol=rtol), err
        return out

    # Config 1: ConvTBC(in=8, out=16, kernel_size=3, padding=1), T=16, B=2
    # (fold path: C_in < 128, single grid tile).
    kx, kw, kb = jax.random.split(jax.random.PRNGKey(0), 3)
    x1 = jax.random.normal(kx, (16, 2, 8), dtype=jnp.float32)
    w1 = 0.1 * jax.random.normal(kw, (3, 8, 16), dtype=jnp.float32)
    b1 = 0.1 * jax.random.normal(kb, (16,), dtype=jnp.float32)
    o1 = _check(x1, w1, b1, padding=1, atol=1e-5, rtol=1e-5)
    assert o1.shape == (16, 2, 16)

    # Same config with bf16 compute (MXU bf16 peak), looser tolerance.
    _check(x1, w1, b1, padding=1, atol=1e-1, rtol=1e-1,
           compute_dtype=jnp.bfloat16)

    # Config 2: multi-tile M grid (n_m = 2), K=5, padding=2 (fold path).
    kx, kw, kb = jax.random.split(jax.random.PRNGKey(1), 3)
    x2 = jax.random.normal(kx, (80, 8, 16), dtype=jnp.float32)
    w2 = 0.1 * jax.random.normal(kw, (5, 16, 32), dtype=jnp.float32)
    b2 = 0.1 * jax.random.normal(kb, (32,), dtype=jnp.float32)
    _check(x2, w2, b2, padding=2, atol=1e-3, rtol=1e-3)

    # Config 3: C_in = 128 -> per-tap f32-scratch accumulation path.
    kx, kw, kb = jax.random.split(jax.random.PRNGKey(2), 3)
    x3 = jax.random.normal(kx, (24, 4, 128), dtype=jnp.float32)
    w3 = 0.05 * jax.random.normal(kw, (3, 128, 128), dtype=jnp.float32)
    b3 = 0.05 * jax.random.normal(kb, (128,), dtype=jnp.float32)
    _check(x3, w3, b3, padding=1, atol=1e-3, rtol=1e-3)

    print("KERNEL_OK")
</pallas_src>

<mosaic_0001>
module attributes {stable_mosaic.version = 11 : i64} {
  func.func @_conv_tbc_kernel(%arg0: i32, %arg1: i32, %arg2: memref<32x8xf32, #tpu.memory_space<vmem>>, %arg3: memref<32x8xf32, #tpu.memory_space<vmem>>, %arg4: memref<24x128xf32, #tpu.memory_space<vmem>>, %arg5: memref<1x128xf32, #tpu.memory_space<vmem>>, %arg6: memref<32x128xf32, #tpu.memory_space<vmem>>, %arg7: memref<48x8xf32, #tpu.memory_space<vmem>>, %arg8: memref<32x128xf32, #tpu.memory_space<vmem>>) attributes {dimension_semantics = [#tpu.dimension_semantics<parallel>, #tpu.dimension_semantics<parallel>], iteration_bounds = array<i64: 1, 1>, scalar_prefetch = 0 : i64, scratch_operands = 2 : i64, tpu.core_type = #tpu.core_type<tc>, window_params = [{transform_indices = @transform_0, window_bounds = array<i64: 32, 8>}, {transform_indices = @transform_1, window_bounds = array<i64: 32, 8>}, {transform_indices = @transform_2, window_bounds = array<i64: 24, 128>}, {transform_indices = @transform_3, window_bounds = array<i64: 1, 128>}, {transform_indices = @transform_4, window_bounds = array<i64: 32, 128>}]} {
    %c0 = arith.constant 0 : index
    %c0_0 = arith.constant 0 : index
    %0 = vector.load %arg2[%c0, %c0_0] : memref<32x8xf32, #tpu.memory_space<vmem>>, vector<32x8xf32>
    %c0_1 = arith.constant 0 : index
    %c0_2 = arith.constant 0 : index
    %1 = vector.load %arg7[%c0_1, %c0_2] : memref<48x8xf32, #tpu.memory_space<vmem>>, vector<32x8xf32>
    tpu.vector_store %arg7[%c0_1, %c0_2], %0 {strides = array<i32>} : memref<48x8xf32, #tpu.memory_space<vmem>>, vector<32x8xf32>,
    %c0_3 = arith.constant 0 : index
    %c0_4 = arith.constant 0 : index
    %2 = vector.load %arg3[%c0_3, %c0_4] : memref<32x8xf32, #tpu.memory_space<vmem>>, vector<16x8xf32>
    %c32 = arith.constant 32 : index
    %c0_5 = arith.constant 0 : index
    %3 = vector.load %arg7[%c32, %c0_5] : memref<48x8xf32, #tpu.memory_space<vmem>>, vector<16x8xf32>
    tpu.vector_store %arg7[%c32, %c0_5], %2 {strides = array<i32>} : memref<48x8xf32, #tpu.memory_space<vmem>>, vector<16x8xf32>,
    %c0_6 = arith.constant 0 : index
    %c0_7 = arith.constant 0 : index
    %4 = vector.load %arg7[%c0_6, %c0_7] : memref<48x8xf32, #tpu.memory_space<vmem>>, vector<32x8xf32>
    %c2 = arith.constant 2 : index
    %c0_8 = arith.constant 0 : index
    %5 = vector.load %arg7[%c2, %c0_8] : memref<48x8xf32, #tpu.memory_space<vmem>>, vector<32x8xf32>
    %c4 = arith.constant 4 : index
    %c0_9 = arith.constant 0 : index
    %6 = vector.load %arg7[%c4, %c0_9] : memref<48x8xf32, #tpu.memory_space<vmem>>, vector<32x8xf32>
    %7 = tpu.concatenate %4, %5, %6 in 1 : vector<32x8xf32>, vector<32x8xf32>, vector<32x8xf32> -> vector<32x24xf32>
    %c0_10 = arith.constant 0 : index
    %c0_11 = arith.constant 0 : index
    %8 = vector.load %arg4[%c0_10, %c0_11] : memref<24x128xf32, #tpu.memory_space<vmem>>, vector<24x128xf32>
    %cst = arith.constant dense<0.000000e+00> : vector<32x128xf32>
    %9 = tpu.matmul %7, %8, %cst {dimension_numbers = #tpu.dot_dimension_numbers<[1], [0], [0], [1], [0, 0, 1, 1], [], []>} : vector<32x24xf32>, vector<24x128xf32>, vector<32x128xf32> -> vector<32x128xf32>
    %c0_12 = arith.constant 0 : index
    %c0_13 = arith.constant 0 : index
    %10 = vector.load %arg8[%c0_12, %c0_13] : memref<32x128xf32, #tpu.memory_space<vmem>>, vector<32x128xf32>
    tpu.vector_store %arg8[%c0_12, %c0_13], %9 {strides = array<i32>} : memref<32x128xf32, #tpu.memory_space<vmem>>, vector<32x128xf32>,
    %c0_14 = arith.constant 0 : index
    %c0_15 = arith.constant 0 : index
    %11 = vector.load %arg8[%c0_14, %c0_15] : memref<32x128xf32, #tpu.memory_space<vmem>>, vector<32x128xf32>
    %c0_16 = arith.constant 0 : index
    %c0_17 = arith.constant 0 : index
    %12 = vector.load %arg5[%c0_16, %c0_17] : memref<1x128xf32, #tpu.memory_space<vmem>>, vector<1x128xf32>
    %13 = vector.broadcast %12 : vector<1x128xf32> to vector<32x128xf32>
    %14 = arith.addf %11, %13 : vector<32x128xf32>
    %c0_18 = arith.constant 0 : index
    %c0_19 = arith.constant 0 : index
    %15 = vector.load %arg6[%c0_18, %c0_19] : memref<32x128xf32, #tpu.memory_space<vmem>>, vector<32x128xf32>
    tpu.vector_store %arg6[%c0_18, %c0_19], %14 {strides = array<i32>} : memref<32x128xf32, #tpu.memory_space<vmem>>, vector<32x128xf32>,
    return
  }
  func.func @transform_0(%arg0: i32, %arg1: i32) -> (i32, i32) {
    %c0_i32 = arith.constant 0 : i32
    %c0_i32_0 = arith.constant 0 : i32
    return %arg0, %c0_i32 : i32, i32
  }
  func.func @transform_1(%arg0: i32, %arg1: i32) -> (i32, i32) {
    %c1_i32 = arith.constant 1 : i32
    %0 = arith.addi %arg0, %c1_i32 : i32
    %c0_i32 = arith.constant 0 : i32
    %c0_i32_0 = arith.constant 0 : i32
    return %0, %c0_i32 : i32, i32
  }
  func.func @transform_2(%arg0: i32, %arg1: i32) -> (i32, i32) {
    %c0_i32 = arith.constant 0 : i32
    %c0_i32_0 = arith.constant 0 : i32
    return %c0_i32, %arg1 : i32, i32
  }
  func.func @transform_3(%arg0: i32, %arg1: i32) -> (i32, i32) {
    %c0_i32 = arith.constant 0 : i32
    %c0_i32_0 = arith.constant 0 : i32
    return %c0_i32, %arg1 : i32, i32
  }
  func.func @transform_4(%arg0: i32, %arg1: i32) -> (i32, i32) {
    %c0_i32 = arith.constant 0 : i32
    return %arg0, %arg1 : i32, i32
  }
}

</mosaic_0001>

<bundles_post_ra>
// kernel: tpu_custom_call.1
= control target key start
LH: loop header
LB: loop body
LE: loop exit
PB: predicated region body
PF: predicated region fallthrough
CT: control target
= control target key end

     0   :  { %vm44_vm0 = vcmask 64512   ;;  %s404_s0 = inlined_call_operand.vmem [shape: f32[64,8], index: 0, kind: input, shape index: {}]   ;;  %s405_s1 = inlined_call_operand.vmem [shape: f32[64,8], index: 1, kind: input, shape index: {}]   ;;  %s406_s2 = inlined_call_operand.vmem [shape: f32[24,128], index: 2, kind: input, shape index: {}]   ;;  %s407_s3 = inlined_call_operand.vmem [shape: f32[1,128], index: 3, kind: input, shape index: {}]   ;;  %s408_s4 = inlined_call_operand.hbm [shape: f32[32,128], index: 4, kind: output, shape index: {}]  }
   0x1   :  { %v41_v0 = vld [vmem:[%s404_s0 + $0x8] sm:$0xff]  ;;  %v42_v1 = vld [vmem:[%s404_s0 + $0x10] sm:$0xff]  ;;  %v40_v2 = vld [vmem:[%s404_s0] sm:$0xff] }
   0x2   :  { %46 = vst.msk [vmem:[#allocation2 + $0x8] sm:$0xff] %vm44_vm0, %v41_v0  ;;  %47 = vst.msk [vmem:[#allocation2 + $0x10] sm:$0xff] %vm44_vm0, %v42_v1  ;;  %v43_v3 = vld [vmem:[%s404_s0 + $0x18] sm:$0xff]  ;;  %v252_v4 = vld [vmem:[%s405_s1 + $0x20] sm:$0xff] }
   0x3   :  { %45 = vst.msk [vmem:[#allocation2] sm:$0xff] %vm44_vm0, %v40_v2  ;;  %48 = vst.msk [vmem:[#allocation2 + $0x18] sm:$0xff] %vm44_vm0, %v43_v3  ;;  %v106_v5 = vld [vmem:[%s406_s2] sm:$0xff]  ;;  %v107_v6 = vld [vmem:[%s406_s2 + $0x8] sm:$0xff] }
   0x4   :  { %51 = vst.msk [vmem:[#allocation2 + $0x20] sm:$0xff] %vm44_vm0, %v252_v4 }
   0x5   :  { %9 = vsyncpa [#allocation5], 0  ;;  %v278_v7 = vpack.c.bf16 %v107_v6, %v106_v5  ;;  %v108_v8 = vld [vmem:[%s406_s2 + $0x10] sm:$0xff]  ;;  %s314_s29 = smov 8   ;;  %s315_s2 = smov 16   ;;  %vm101_vm1 = vcmask 130048  }
   0x6   :  { %vm109_vm2 = vcmask 195584   ;;  %v258_v37 = vld [vmem:[%s407_s3] ss:$0 sm:$0xff]  ;;  %s316_s6 = smov [#allocation4]  }
   0x7   :  { %279 = vmatprep.subr.bf16.mxu0 %v278_v7  ;;  %282 = vmatprep.subr.bf16.mxu1 %v278_v7  ;;  %s235_s7 = sshll.u32 %s316_s6, 4  ;;  %s236_s7 = int_to_ptr.vmem [resolvable:$true] %s235_s7 }
   0x8   :  { %281 = vmatpush3.bf16.msra.mxu0 %v278_v7  ;;  %284 = vmatpush3.bf16.msra.mxu1 %v278_v7  ;;  %s290_s8 = scalar_lea.vmem %s236_s7, 512  ;;  %p295_p1 = scmp.lt.s32.totalorder %s236_s7, %s236_s7 }
   0x9   :  { %270 = vmatprep.subr.mxu0 %v108_v8  ;;  %283 = vmatprep.subr.mxu1 %v108_v8  ;;  %v58_v9 = vld [vmem:[#allocation2 + $0xa] sm:$0xff]  ;;  %p291_p0 = scmp.ne.s32.totalorder %s236_s7, %s290_s8  ;;  %p296_p2 = scmp.lt.s32.totalorder %s290_s8, %s290_s8 }
   0xa   :  { %71 = vrot.lane.b32.xlu1 %v58_v9, %s314_s29  ;;  %v57_v10 = vld [vmem:[#allocation2 + $0x2] sm:$0xff]  ;;  %v59_v12 = vld [vmem:[#allocation2 + $0x12] sm:$0xff] }
   0xb   :  { %69 = vrot.lane.b32.xlu0 %v57_v10, %s314_s29  ;;  %v60_v11 = vld [vmem:[#allocation2 + $0x1a] sm:$0xff]  ;;  %v61_v14 = vld [vmem:[#allocation2 + $0x4] sm:$0xff]  ;;  %v62_v16 = vld [vmem:[#allocation2 + $0xc] sm:$0xff]  ;;  %p297_p3 = por %p296_p2, %p295_p1 }
   0xc   :  { %271 = vmatpush3.msra.mxu0 %v108_v8  ;;  %285 = vmatpush3.msra.mxu1 %v108_v8  ;;  %v63_v13 = vld [vmem:[#allocation2 + $0x14] sm:$0xff]  ;;  %v64_v15 = vld [vmem:[#allocation2 + $0x1c] sm:$0xff]  ;;  %v54_v29 = vld [vmem:[#allocation2 + $0x8] sm:$0xff] }
   0xd   :  { %v55_v20 = vld [vmem:[#allocation2 + $0x10] sm:$0xff]  ;;  %v53_v22 = vld [vmem:[#allocation2] sm:$0xff]  ;;  %v56_v26 = vld [vmem:[#allocation2 + $0x18] sm:$0xff]  ;;  %p298_p4 = pnand %p297_p3, %p291_p0 }
   0xe   :  { %75 = vrot.lane.b32.xlu1 %v60_v11, %s314_s29 }
   0xf   :  { %73 = vrot.lane.b32.xlu0 %v59_v12, %s314_s29 }
  0x12   :  { %89 = vrot.lane.b32.xlu1 %v63_v13, %s315_s2 }
  0x13   :  { %85 = vrot.lane.b32.xlu0 %v61_v14, %s315_s2 }
  0x16   :  { %91 = vrot.lane.b32.xlu1 %v64_v15, %s315_s2 }
  0x17   :  { %87 = vrot.lane.b32.xlu0 %v62_v16, %s315_s2 }
  0x7c   :  { %v72_v17 = vpop.permute.xlu1 %71 }
  0x7d   :  { %v70_v18 = vpop.permute.xlu0 %69  ;;  %v98_v33 = vsel %vm44_vm0, %v54_v29, %v72_v17 }
  0x7e   :  { %v97_v25 = vsel %vm44_vm0, %v53_v22, %v70_v18 }
  0x80   :  { %v76_v19 = vpop.permute.xlu1 %75 }
  0x81   :  { %v74_v21 = vpop.permute.xlu0 %73  ;;  %v100_v31 = vsel %vm44_vm0, %v56_v26, %v76_v19 }
  0x82   :  { %v99_v23 = vsel %vm44_vm0, %v55_v20, %v74_v21 }
  0x84   :  { %v90_v24 = vpop.permute.xlu1 %89 }
  0x85   :  { %v86_v27 = vpop.permute.xlu0 %85  ;;  %v104_v28 = vsel %vm101_vm1, %v99_v23, %v90_v24 }
  0x86   :  { %v102_v30 = vsel %vm101_vm1, %v97_v25, %v86_v27  ;;  %275 = vmatprep.mubr.msk.f32.mxu1 %vm109_vm2, %v104_v28 }
  0x87   :  { %272 = vmatprep.mubr.msk.f32.mxu0 %vm109_vm2, %v102_v30 }
  0x88   :  { %v92_v32 = vpop.permute.xlu1 %91 }
  0x89   :  { %v105_v34 = vsel %vm101_vm1, %v100_v31, %v92_v32  ;;  %v88_v35 = vpop.permute.xlu0 %87 }
  0x8a   :  { %v103_v36 = vsel %vm101_vm1, %v98_v33, %v88_v35  ;;  %276 = vmatmul.mubr.msk.f32.vlgmr.msra.gmra.mrb[0].mxu1 %vm109_vm2, %v105_v34 }
  0x8b   :  { %273 = vmatmul.mubr.msk.f32.vlgmr.msra.gmra.mrb[0].mxu0 %vm109_vm2, %v103_v36 }
 0x15d   :  { %v277_v38 = vpop.f32.mrb[0].mxu1 }
 0x15e   :  { %v274_v39 = vpop.f32.mrb[0].mxu0  ;;  %v225_v40 = vadd.f32 %v277_v38, %v258_v37  ;;  %v198_v41 = vpop.f32.mrb[1].mxu1 }
 0x15f   :  { %v223_v42 = vadd.f32 %v274_v39, %v258_v37  ;;  %v188_v43 = vpop.f32.mrb[1].mxu0  ;;  %v224_v44 = vadd.f32 %v258_v37, %v198_v41 }
 0x160   :  { %229 = vst [vmem:[#allocation4 + $0x18] sm:$0xff] %v225_v40  ;;  %v222_v45 = vadd.f32 %v258_v37, %v188_v43 }
 0x161   :  { %227 = vst [vmem:[#allocation4 + $0x8] sm:$0xff] %v223_v42  ;;  %228 = vst [vmem:[#allocation4 + $0x10] sm:$0xff] %v224_v44 }
 0x162   :  { %226 = vst [vmem:[#allocation4] sm:$0xff] %v222_v45 }
 0x163   :  { %301 = shalt.err (!%p298_p4)
}
 0x164   :  { %s302_s10 = scalar_lea.hbm %s408_s4, 512 }
 0x165   :  { %p303_p5 = scmp.ne.s32.totalorder %s408_s4, %s302_s10  ;;  %p306_p6 = scmp.lt.u32.totalorder %s302_s10, %s408_s4 }
 0x167   :  { %p308_p7 = pnand %p306_p6, %p303_p5 }
 0x169   :  { %311 = shalt.err (!%p308_p7)
}
 0x16a   :  { %s317_s15 = smov 128  }
 0x16b   :  { %241 = dma.vmem_to_hbm [thread:$0]  %s236_s7, 512, %s408_s4, [#allocation5], %s317_s15, %s317_s15, %s314_s29  }
 0x16c   :  { %312 = dma.done.wait [#allocation5], 512  }
 0x16d   :  { %313 = vsyncadd [#allocation5], 4294966784 }
 0x16e   :  { %245 = vsyncpa [#allocation5], 1 }

</bundles_post_ra>
